<compile_context>
chip_gen: v5e
topology: v5e:2x2
jax: 0.10.0
libtpu: 0.0.40
codegen_flags: <defaults>
</compile_context>

<pallas_src>
import jax
import jax.numpy as jnp
from jax.experimental import pallas as pl
from jax.experimental.pallas import tpu as pltpu


def _round_up(n, m):
    return ((n + m - 1) // m) * m


def mlp_kernel(params_ref, x_ref, o_ref):
    hp = jax.lax.Precision.HIGHEST
    x = x_ref[...]                           # (TB, 8) natural layout, no staging

    # Aligned 8-sublane bands of the packed parameter buffer (lane offset 0).
    w1 = params_ref[0:8, 0:8]                # rows 0:6 = W1, rows 6:8 = 0
    w2a = params_ref[8:16, 0:8]              # rows 0:4 = [W2 | b2 | 0], row 4 = e_6
    w3a = params_ref[16:24, 0:8]             # row 0   = [W3 | b3 | 0 0 0]
    b1 = params_ref[24:32, 0:1]              # (8,1): rows 0:6 = b1, row 6 = 1.0

    # Layer 1: Linear(8->6)+ReLU. Contract the feature dim of both operands so
    # the transpose happens inside the MXU push; bias via broadcast VPU add.
    dn = (((1,), (1,)), ((), ()))
    z1 = jax.lax.dot_general(w1, x, dn, precision=hp,
                             preferred_element_type=jnp.float32)        # (8, TB)
    h1 = jnp.maximum(z1 + b1, 0.0)           # row 6 == 1.0 (bias lane for layer 2)

    # Layer 2: Linear(6->4)+ReLU, bias folded via the ones row of h1.
    h2 = jnp.maximum(
        jnp.dot(w2a, h1, precision=hp, preferred_element_type=jnp.float32),
        0.0)                                  # (8, TB), row 4 == 1.0

    # Layer 3: Linear(4->1)+Sigmoid, bias folded via the ones row of h2.
    z3 = jnp.dot(w3a, h2, precision=hp, preferred_element_type=jnp.float32)  # (8, TB)
    o_ref[...] = jax.lax.logistic(z3[0:1, :])                                # (1, TB)


def mlp_forward(x, packed_params):
    """x: (B, 8) -> (B, 1) float32."""
    B = x.shape[0]
    assert x.ndim == 2 and x.shape[1] == 8

    TB_MAX = 4096                              # fat lane tile (multiple of 256)
    B256 = _round_up(max(B, 1), 256)
    TB = min(TB_MAX, B256)
    grid_b = pl.cdiv(B256, TB)                 # >= 2 automatically once B > TB_MAX
    B_pad = grid_b * TB

    x32 = x.astype(jnp.float32)
    if B_pad != B:
        x32 = jnp.pad(x32, ((0, B_pad - B), (0, 0)))

    out = pl.pallas_call(
        mlp_kernel,
        out_shape=jax.ShapeDtypeStruct((1, B_pad), jnp.float32),
        grid=(grid_b,),
        in_specs=[
            pl.BlockSpec((32, 128), lambda i: (0, 0)),   # packed params, resident
            pl.BlockSpec((TB, 8), lambda i: (i, 0)),     # x tile, natural layout
        ],
        out_specs=pl.BlockSpec((1, TB), lambda i: (0, i)),  # batch on lanes
        compiler_params=pltpu.CompilerParams(
            dimension_semantics=("parallel",)),
    )(packed_params, x32)
    return out[0, :B].reshape(B, 1)


def pack_params(w1, b1, w2, b2, w3, b3):
    """Pack PyTorch-layout params (W: (out,in), b: (out,)) into one (32,128)
    buffer of aligned 8-row bands. Layer-1 bias lives as a column (band 3);
    its row 6 == 1.0 becomes the constant-1 row of h1 after ReLU, which folds
    the layer-2/3 biases into their weight bands."""
    p = jnp.zeros((32, 128), jnp.float32)
    # Band 0: W1 (6,8) in an (8,8) block
    p = p.at[0:6, 0:8].set(w1)
    # Band 1: W2_aug (4,7) + one-hot row propagating the ones lane of h1
    p = p.at[8:12, 0:6].set(w2)
    p = p.at[8:12, 6].set(b2)
    p = p.at[12, 6].set(1.0)
    # Band 2: W3_aug (1,5)
    p = p.at[16, 0:4].set(w3[0])
    p = p.at[16, 4].set(b3[0])
    # Band 3: b1 column; row 6 = 1.0 creates the ones row of h1
    p = p.at[24:30, 0].set(b1)
    p = p.at[30, 0].set(1.0)
    return p


def init_params(key):
    """Deterministic init mimicking nn.Linear's uniform(-1/sqrt(in), 1/sqrt(in)).
    Weights in PyTorch (out, in) layout, biases (out,)."""
    ks = jax.random.split(key, 6)

    def linear(kw, kb, fan_in, fan_out):
        bound = 1.0 / (fan_in ** 0.5)
        w = jax.random.uniform(kw, (fan_out, fan_in), jnp.float32, -bound, bound)
        b = jax.random.uniform(kb, (fan_out,), jnp.float32, -bound, bound)
        return w, b

    w1, b1 = linear(ks[0], ks[1], 8, 6)
    w2, b2 = linear(ks[2], ks[3], 6, 4)
    w3, b3 = linear(ks[4], ks[5], 4, 1)
    return w1, b1, w2, b2, w3, b3


if __name__ == "__main__":
    key = jax.random.PRNGKey(0)
    k_in, k_params = jax.random.split(key)

    batch = 8
    x = jax.random.normal(k_in, (batch, 8), dtype=jnp.float32)
    w1, b1, w2, b2, w3, b3 = init_params(k_params)
    packed = pack_params(w1, b1, w2, b2, w3, b3)

    out = jax.jit(mlp_forward)(x, packed)
    out = jax.block_until_ready(out)

    # Reference in plain JAX (same math as the PyTorch module), highest precision.
    hp = jax.lax.Precision.HIGHEST
    h1 = jnp.maximum(jnp.dot(x, w1.T, precision=hp) + b1, 0.0)
    h2 = jnp.maximum(jnp.dot(h1, w2.T, precision=hp) + b2, 0.0)
    ref = jax.nn.sigmoid(jnp.dot(h2, w3.T, precision=hp) + b3)   # (B, 1)

    assert out.shape == (batch, 1)
    assert jnp.allclose(out, ref, atol=1e-5, rtol=1e-5), "mismatch vs reference"

    print("KERNEL_OK")
</pallas_src>

<mosaic_0001>
module attributes {stable_mosaic.version = 11 : i64} {
  func.func @mlp_kernel(%arg0: i32, %arg1: memref<32x128xf32, #tpu.memory_space<vmem>>, %arg2: memref<256x8xf32, #tpu.memory_space<vmem>>, %arg3: memref<1x256xf32, #tpu.memory_space<vmem>>) attributes {dimension_semantics = [#tpu.dimension_semantics<parallel>], iteration_bounds = array<i64: 1>, scalar_prefetch = 0 : i64, scratch_operands = 0 : i64, tpu.core_type = #tpu.core_type<tc>, window_params = [{pipeline_mode = #tpu.pipeline_mode<synchronous>, transform_indices = @transform_0, window_bounds = array<i64: 32, 128>}, {transform_indices = @transform_1, window_bounds = array<i64: 256, 8>}, {transform_indices = @transform_2, window_bounds = array<i64: 1, 256>}]} {
    %c0 = arith.constant 0 : index
    %c0_0 = arith.constant 0 : index
    %0 = vector.load %arg2[%c0, %c0_0] : memref<256x8xf32, #tpu.memory_space<vmem>>, vector<256x8xf32>
    %c0_1 = arith.constant 0 : index
    %c0_2 = arith.constant 0 : index
    %1 = vector.load %arg1[%c0_1, %c0_2] : memref<32x128xf32, #tpu.memory_space<vmem>>, vector<8x8xf32>
    %c8 = arith.constant 8 : index
    %c0_3 = arith.constant 0 : index
    %2 = vector.load %arg1[%c8, %c0_3] : memref<32x128xf32, #tpu.memory_space<vmem>>, vector<8x8xf32>
    %c16 = arith.constant 16 : index
    %c0_4 = arith.constant 0 : index
    %3 = vector.load %arg1[%c16, %c0_4] : memref<32x128xf32, #tpu.memory_space<vmem>>, vector<8x8xf32>
    %c24 = arith.constant 24 : index
    %c0_5 = arith.constant 0 : index
    %4 = vector.load %arg1[%c24, %c0_5] : memref<32x128xf32, #tpu.memory_space<vmem>>, vector<8x1xf32>
    %cst = arith.constant dense<0.000000e+00> : vector<8x256xf32>
    %5 = tpu.matmul %1, %0, %cst {dimension_numbers = #tpu.dot_dimension_numbers<[1], [1], [0], [0], [0, 0, 1, 0], [], []>, precision = #tpu.contract_precision<fp32>} : vector<8x8xf32>, vector<256x8xf32>, vector<8x256xf32> -> vector<8x256xf32>
    %6 = vector.broadcast %4 : vector<8x1xf32> to vector<8x256xf32>
    %7 = arith.addf %5, %6 : vector<8x256xf32>
    %cst_6 = arith.constant 0.000000e+00 : f32
    %8 = vector.broadcast %cst_6 : f32 to vector<8x256xf32>
    %9 = arith.maximumf %7, %8 : vector<8x256xf32>
    %cst_7 = arith.constant dense<0.000000e+00> : vector<8x256xf32>
    %10 = tpu.matmul %2, %9, %cst_7 {dimension_numbers = #tpu.dot_dimension_numbers<[1], [0], [0], [1], [0, 0, 1, 1], [], []>, precision = #tpu.contract_precision<fp32>} : vector<8x8xf32>, vector<8x256xf32>, vector<8x256xf32> -> vector<8x256xf32>
    %cst_8 = arith.constant 0.000000e+00 : f32
    %11 = vector.broadcast %cst_8 : f32 to vector<8x256xf32>
    %12 = arith.maximumf %10, %11 : vector<8x256xf32>
    %cst_9 = arith.constant dense<0.000000e+00> : vector<8x256xf32>
    %13 = tpu.matmul %3, %12, %cst_9 {dimension_numbers = #tpu.dot_dimension_numbers<[1], [0], [0], [1], [0, 0, 1, 1], [], []>, precision = #tpu.contract_precision<fp32>} : vector<8x8xf32>, vector<8x256xf32>, vector<8x256xf32> -> vector<8x256xf32>
    %14 = vector.extract_strided_slice %13 {offsets = [0, 0], sizes = [1, 256], strides = [1, 1]} : vector<8x256xf32> to vector<1x256xf32>
    %15 = arith.negf %14 : vector<1x256xf32>
    %16 = math.exp %15 : vector<1x256xf32>
    %cst_10 = arith.constant 1.000000e+00 : f32
    %17 = vector.broadcast %cst_10 : f32 to vector<1x256xf32>
    %18 = arith.addf %17, %16 : vector<1x256xf32>
    %19 = arith.divf %17, %18 : vector<1x256xf32>
    %c0_11 = arith.constant 0 : index
    %c0_12 = arith.constant 0 : index
    %20 = vector.load %arg3[%c0_11, %c0_12] : memref<1x256xf32, #tpu.memory_space<vmem>>, vector<1x256xf32>
    tpu.vector_store %arg3[%c0_11, %c0_12], %19 {strides = array<i32>} : memref<1x256xf32, #tpu.memory_space<vmem>>, vector<1x256xf32>,
    return
  }
  func.func @transform_0(%arg0: i32) -> (i32, i32) {
    %c0_i32 = arith.constant 0 : i32
    %c0_i32_0 = arith.constant 0 : i32
    %c0_i32_1 = arith.constant 0 : i32
    return %c0_i32, %c0_i32_0 : i32, i32
  }
  func.func @transform_1(%arg0: i32) -> (i32, i32) {
    %c0_i32 = arith.constant 0 : i32
    %c0_i32_0 = arith.constant 0 : i32
    return %arg0, %c0_i32 : i32, i32
  }
  func.func @transform_2(%arg0: i32) -> (i32, i32) {
    %c0_i32 = arith.constant 0 : i32
    %c0_i32_0 = arith.constant 0 : i32
    return %c0_i32, %arg0 : i32, i32
  }
}

</mosaic_0001>

<bundles_post_ra>
// kernel: mlp_forward.1
= control target key start
LH: loop header
LB: loop body
LE: loop exit
PB: predicated region body
PF: predicated region fallthrough
CT: control target
= control target key end

     0   :  { %vm52_vm0 = vcmask 64512   ;;  %vm1469_vm9 = vcmask 1040384   ;;  %s2165_s1 = inlined_call_operand.vmem [shape: f32[256,8], index: 1, kind: input, shape index: {}]   ;;  %s2166_s0 = inlined_call_operand.vmem [shape: f32[32,128], index: 0, kind: input, shape index: {}]   ;;  %s2167_s2 = inlined_call_operand.vmem [shape: f32[1,256], index: 2, kind: output, shape index: {}]  }
   0x1   :  { %v26_v0 = vld [vmem:[%s2165_s1 + $0x78] sm:$0xff]  ;;  %v25_v1 = vld [vmem:[%s2165_s1 + $0x70] sm:$0xff]  ;;  %v24_v2 = vld [vmem:[%s2165_s1 + $0x68] sm:$0xff] }
   0x2   :  { %v102_v3 = vsel %vm52_vm0, %v26_v0, 0  ;;  %v99_v4 = vsel %vm52_vm0, %v25_v1, 0  ;;  %v96_v5 = vsel %vm52_vm0, %v24_v2, 0  ;;  %v23_v6 = vld [vmem:[%s2165_s1 + $0x60] sm:$0xff]  ;;  %v22_v7 = vld [vmem:[%s2165_s1 + $0x58] sm:$0xff]  ;;  %v21_v17 = vld [vmem:[%s2165_s1 + $0x50] sm:$0xff] }
   0x3   :  { %v1527_v8 = vand.u32 4294901760, %v102_v3  ;;  %v1529_v9 = vand.u32 4294901760, %v99_v4  ;;  %v1531_v10 = vand.u32 4294901760, %v96_v5  ;;  %v93_v11 = vsel %vm52_vm0, %v23_v6, 0  ;;  %v20_v26 = vld [vmem:[%s2165_s1 + $0x48] sm:$0xff]  ;;  %v19_v34 = vld [vmem:[%s2165_s1 + $0x40] sm:$0xff] }
   0x4   :  { %v1534_v12 = vand.u32 4294901760, %v93_v11  ;;  %v90_v16 = vsel %vm52_vm0, %v22_v7, 0  ;;  %v87_v21 = vsel %vm52_vm0, %v21_v17, 0  ;;  %v84_v29 = vsel %vm52_vm0, %v20_v26, 0  ;;  %v18_v41 = vld [vmem:[%s2165_s1 + $0x38] sm:$0xff]  ;;  %v17_v48 = vld [vmem:[%s2165_s1 + $0x30] sm:$0xff] }
   0x5   :  { %153 = vmatpush.xpose.msra.mxu0 %v1527_v8  ;;  %v1538_v13 = vsub.f32 %v102_v3, %v1527_v8  ;;  %349 = vmatpush.xpose.msra.mxu3 %v1527_v8  ;;  %v1542_v14 = vsub.f32 %v99_v4, %v1529_v9  ;;  %v1545_v15 = vsub.f32 %v96_v5, %v1531_v10  ;;  %v1554_v20 = vand.u32 4294901760, %v90_v16  ;;  %v16_v54 = vld [vmem:[%s2165_s1 + $0x28] sm:$0xff]  ;;  %v15_v62 = vld [vmem:[%s2165_s1 + $0x20] sm:$0xff]  ;;  %v14_v5 = vld [vmem:[%s2165_s1 + $0x18] sm:$0xff] }
   0x6   :  { %v1567_v25 = vsub.f32 %v93_v11, %v1534_v12  ;;  %v1573_v28 = vand.u32 4294901760, %v87_v21  ;;  %v1589_v35 = vand.u32 4294901760, %v84_v29  ;;  %v81_v40 = vsel %vm52_vm0, %v19_v34, 0 }
   0x7   :  { %296 = vmatpush.xpose.msra.mxu2 %v1538_v13  ;;  %v195_v18 = vand.u32 4294901760, %v1538_v13  ;;  %v201_v19 = vand.u32 4294901760, %v1542_v14  ;;  %v207_v24 = vand.u32 4294901760, %v1545_v15  ;;  %v1582_v33 = vsub.f32 %v90_v16, %v1554_v20 }
   0x8   :  { %v213_v32 = vand.u32 4294901760, %v1567_v25  ;;  %v1597_v39 = vsub.f32 %v87_v21, %v1573_v28  ;;  %v1606_v42 = vsub.f32 %v84_v29, %v1589_v35  ;;  %v1612_v45 = vand.u32 4294901760, %v81_v40 }
   0x9   :  { %155 = vmatpush.xpose.msra.mxu0 %v1529_v9  ;;  %v196_v22 = vsub.f32 %v1538_v13, %v195_v18  ;;  %351 = vmatpush.xpose.msra.mxu3 %v1529_v9  ;;  %v202_v23 = vsub.f32 %v1542_v14, %v201_v19  ;;  %v208_v31 = vsub.f32 %v1545_v15, %v207_v24  ;;  %v219_v38 = vand.u32 4294901760, %v1582_v33 }
   0xa   :  { %v214_v37 = vsub.f32 %v1567_v25, %v213_v32  ;;  %v225_v46 = vand.u32 4294901760, %v1597_v39  ;;  %v78_v47 = vsel %vm52_vm0, %v18_v41, 0  ;;  %v231_v49 = vand.u32 4294901760, %v1606_v42  ;;  %v41_v41 = vld [vmem:[%s2165_s1 + $0xf0] sm:$0xff] }
   0xb   :  { %v197_v27 = vand.u32 4294901760, %v196_v22  ;;  %299 = vmatpush.xpose.msra.mxu2 %v1542_v14  ;;  %v203_v30 = vand.u32 4294901760, %v202_v23  ;;  %v209_v36 = vand.u32 4294901760, %v208_v31  ;;  %v220_v44 = vsub.f32 %v1582_v33, %v219_v38  ;;  %v13_v22 = vld [vmem:[%s2165_s1 + $0x10] sm:$0xff]  ;;  %v42_v31 = vld [vmem:[%s2165_s1 + $0xf8] sm:$0xff] }
   0xc   :  { %v215_v43 = vand.u32 4294901760, %v214_v37  ;;  %v226_v51 = vsub.f32 %v1597_v39, %v225_v46  ;;  %v1626_v52 = vand.u32 4294901760, %v78_v47  ;;  %v1629_v53 = vsub.f32 %v81_v40, %v1612_v45  ;;  %v34_v14 = vld [vmem:[%s2165_s1 + $0xb8] sm:$0xff] }
   0xd   :  { %157 = vmatpush.xpose.msra.mxu0 %v1531_v10  ;;  %198 = vmatpush.xpose.msra.mxu1 %v197_v27  ;;  %v221_v50 = vand.u32 4294901760, %v220_v44  ;;  %v75_v55 = vsel %vm52_vm0, %v17_v48, 0  ;;  %v232_v56 = vsub.f32 %v1606_v42, %v231_v49  ;;  %v72_v57 = vsel %vm52_vm0, %v16_v54, 0 }
   0xe   :  { %353 = vmatpush.xpose.msra.mxu3 %v1531_v10  ;;  %v227_v58 = vand.u32 4294901760, %v226_v51  ;;  %v1642_v59 = vand.u32 4294901760, %v75_v55  ;;  %v237_v60 = vand.u32 4294901760, %v1629_v53  ;;  %v1646_v61 = vsub.f32 %v78_v47, %v1626_v52  ;;  %v11_v51 = vld [vmem:[%s2165_s1] sm:$0xff] }
   0xf   :  { %302 = vmatpush.xpose.msra.mxu2 %v1545_v15  ;;  %v233_v63 = vand.u32 4294901760, %v232_v56  ;;  %v1653_v0 = vand.u32 4294901760, %v72_v57  ;;  %v69_v4 = vsel %vm52_vm0, %v15_v62, 0  ;;  %v66_v21 = vsel %vm52_vm0, %v14_v5, 0 }
  0x10   :  { %v238_v1 = vsub.f32 %v1629_v53, %v237_v60  ;;  %v2178_v2 = vand.u32 4294901760, %v1646_v61  ;;  %v1661_v3 = vsub.f32 %v75_v55, %v1642_v59  ;;  %v1669_v6 = vand.u32 4294901760, %v69_v4 }
  0x11   :  { %159 = vmatpush.xpose.msra.mxu0 %v1534_v12  ;;  %204 = vmatpush.xpose.msra.mxu1 %v203_v30  ;;  %v1677_v17 = vsub.f32 %v72_v57, %v1653_v0  ;;  %v1692_v29 = vand.u32 4294901760, %v66_v21  ;;  %v63_v34 = vsel %vm52_vm0, %v13_v22, 0  ;;  %v150_v40 = vsel %vm52_vm0, %v42_v31, 0  ;;  %v40_v57 = vld [vmem:[%s2165_s1 + $0xe8] sm:$0xff] }
  0x12   :  { %355 = vmatpush.xpose.msra.mxu3 %v1534_v12  ;;  %v239_v7 = vand.u32 4294901760, %v238_v1  ;;  %v244_v11 = vsub.f32 %v1646_v61, %v2178_v2  ;;  %v2175_v16 = vand.u32 4294901760, %v1661_v3  ;;  %v1686_v23 = vsub.f32 %v69_v4, %v1669_v6 }
  0x13   :  { %305 = vmatpush.xpose.msra.mxu2 %v1567_v25  ;;  %v2173_v30 = vand.u32 4294901760, %v1677_v17  ;;  %v1713_v47 = vand.u32 4294901760, %v63_v34  ;;  %v1716_v48 = vsub.f32 %v66_v21, %v1692_v29  ;;  %v1724_v54 = vand.u32 4294901760, %v150_v40 }
  0x14   :  { %v245_v26 = vand.u32 4294901760, %v244_v11  ;;  %v250_v27 = vsub.f32 %v1661_v3, %v2175_v16  ;;  %v2172_v37 = vand.u32 4294901760, %v1686_v23  ;;  %v147_v55 = vsel %vm52_vm0, %v41_v41, 0 }
  0x15   :  { %161 = vmatpush.xpose.msra.mxu0 %v1554_v20  ;;  %210 = vmatpush.xpose.msra.mxu1 %v209_v36  ;;  %v12_v36 = vld [vmem:[%s2165_s1 + $0x8] sm:$0xff]  ;;  %v256_v44 = vsub.f32 %v1677_v17, %v2173_v30  ;;  %v1738_v1 = vsub.f32 %v63_v34, %v1713_v47  ;;  %v57_v4 = vsel %vm52_vm0, %v11_v51, 0  ;;  %v1742_v5 = vand.u32 4294901760, %v147_v55  ;;  %v39_v34 = vld [vmem:[%s2165_s1 + $0xe0] sm:$0xff] }
  0x16   :  { %357 = vmatpush.xpose.msra.mxu3 %v1554_v20  ;;  %v262_v56 = vsub.f32 %v1686_v23, %v2172_v37  ;;  %v144_v11 = vsel %vm52_vm0, %v40_v57, 0  ;;  %v36_v30 = vld [vmem:[%s2165_s1 + $0xc8] sm:$0xff]  ;;  %v126_v15 = vsel %vm52_vm0, %v34_v14, 0 }
  0x17   :  { %308 = vmatpush.xpose.msra.mxu2 %v1582_v33  ;;  %v132_v13 = vsel %vm52_vm0, %v36_v30, 0  ;;  %v43_v33 = vld [vmem:[%s2166_s0] sm:$0xff] }
  0x18   :  { %v263_v21 = vand.u32 4294901760, %v262_v56  ;;  %v38_v56 = vld [vmem:[%s2165_s1 + $0xd8] sm:$0xff] }
  0x19   :  { %163 = vmatpush.xpose.msra.mxu0 %v1573_v28  ;;  %216 = vmatpush.xpose.msra.mxu1 %v215_v43  ;;  %v251_v43 = vand.u32 4294901760, %v250_v27  ;;  %v2168_v27 = vand.u32 4294901760, %v1738_v1 }
  0x1a   :  { %359 = vmatpush.xpose.msra.mxu3 %v1573_v28 }
  0x1b   :  { %311 = vmatpush.xpose.msra.mxu2 %v1597_v39 }
  0x1d   :  { %165 = vmatpush.xpose.msra.mxu0 %v1589_v35  ;;  %222 = vmatpush.xpose.msra.mxu1 %v221_v50  ;;  %v60_v50 = vsel %vm52_vm0, %v12_v36, 0  ;;  %v1764_v36 = vsub.f32 %v147_v55, %v1742_v5 }
  0x1e   :  { %361 = vmatpush.xpose.msra.mxu3 %v1589_v35  ;;  %v1734_v62 = vand.u32 4294901760, %v60_v50 }
  0x1f   :  { %314 = vmatpush.xpose.msra.mxu2 %v1606_v42  ;;  %v2174_v57 = vand.u32 4294901760, %v1764_v36  ;;  %v29_v42 = vld [vmem:[%s2165_s1 + $0x90] sm:$0xff] }
  0x20   :  { %v1757_v31 = vsub.f32 %v60_v50, %v1734_v62  ;;  %v274_v50 = vsub.f32 %v1738_v1, %v2168_v27 }
  0x21   :  { %167 = vmatpush.xpose.msra.mxu0 %v1612_v45  ;;  %228 = vmatpush.xpose.msra.mxu1 %v227_v58  ;;  %v257_v58 = vand.u32 4294901760, %v256_v44 }
  0x22   :  { %363 = vmatpush.xpose.msra.mxu3 %v1612_v45  ;;  %v2171_v51 = vand.u32 4294901760, %v1757_v31 }
  0x23   :  { %317 = vmatpush.xpose.msra.mxu2 %v1629_v53  ;;  %v111_v53 = vsel %vm52_vm0, %v29_v42, 0 }
  0x24   :  { %v280_v27 = vsub.f32 %v1757_v31, %v2171_v51  ;;  %v1987_v42 = vand.u32 4294901760, %v111_v53 }
  0x25   :  { %169 = vmatpush.xpose.msra.mxu0 %v1626_v52  ;;  %234 = vmatpush.xpose.msra.mxu1 %v233_v63  ;;  %v2169_v63 = vand.u32 4294901760, %v1716_v48 }
  0x26   :  { %365 = vmatpush.xpose.msra.mxu3 %v1626_v52 }
  0x27   :  { %320 = vmatpush.xpose.msra.mxu2 %v1646_v61  ;;  %v268_v22 = vsub.f32 %v1716_v48, %v2169_v63  ;;  %v37_v63 = vld [vmem:[%s2165_s1 + $0xd0] sm:$0xff] }
  0x28   :  { %v135_v37 = vsel %vm52_vm0, %v37_v63, 0 }
  0x29   :  { %171 = vmatpush.xpose.msra.mxu0 %v1642_v59  ;;  %240 = vmatpush.xpose.msra.mxu1 %v239_v7  ;;  %v1746_v7 = vsub.f32 %v150_v40, %v1724_v54  ;;  %v1766_v40 = vand.u32 4294901760, %v144_v11  ;;  %v269_v44 = vand.u32 4294901760, %v268_v22 }
  0x2a   :  { %367 = vmatpush.xpose.msra.mxu3 %v1642_v59 }
  0x2b   :  { %323 = vmatpush.xpose.msra.mxu2 %v1661_v3  ;;  %v2170_v41 = vand.u32 4294901760, %v1746_v7 }
  0x2d   :  { %173 = vmatpush.xpose.msra.mxu0 %v1653_v0  ;;  %246 = vmatpush.xpose.msra.mxu1 %v245_v26  ;;  %v1753_v26 = vand.u32 4294901760, %v57_v4 }
  0x2e   :  { %369 = vmatpush.xpose.msra.mxu3 %v1653_v0 }
  0x2f   :  { %326 = vmatpush.xpose.msra.mxu2 %v1677_v17  ;;  %v1777_v55 = vsub.f32 %v57_v4, %v1753_v26  ;;  %v138_v4 = vsel %vm52_vm0, %v38_v56, 0  ;;  %v543_v56 = vsub.f32 %v1764_v36, %v2174_v57  ;;  %v281_v57 = vand.u32 4294901760, %v280_v27 }
  0x30   :  { %v1811_v51 = vand.u32 4294901760, %v138_v4 }
  0x31   :  { %175 = vmatpush.xpose.msra.mxu0 %v1669_v6  ;;  %252 = vmatpush.xpose.msra.mxu1 %v251_v43  ;;  %v141_v43 = vsel %vm52_vm0, %v39_v34, 0  ;;  %v275_v34 = vand.u32 4294901760, %v274_v50 }
  0x32   :  { %371 = vmatpush.xpose.msra.mxu3 %v1669_v6  ;;  %v1791_v22 = vand.u32 4294901760, %v141_v43  ;;  %v1830_v27 = vsub.f32 %v138_v4, %v1811_v51 }
  0x33   :  { %329 = vmatpush.xpose.msra.mxu2 %v1686_v23 }
  0x34   :  { %v1809_v50 = vsub.f32 %v141_v43, %v1791_v22  ;;  %v544_v43 = vand.u32 4294901760, %v543_v56  ;;  %v560_v30 = vand.u32 4294901760, %v1830_v27 }
  0x35   :  { %177 = vmatpush.xpose.msra.mxu0 %v1692_v29  ;;  %258 = vmatpush.xpose.msra.mxu1 %v257_v58  ;;  %v1785_v58 = vsub.f32 %v144_v11, %v1766_v40  ;;  %v2177_v11 = vand.u32 4294901760, %v1777_v55 }
  0x36   :  { %373 = vmatpush.xpose.msra.mxu3 %v1692_v29 }
  0x37   :  { %332 = vmatpush.xpose.msra.mxu2 %v1716_v48  ;;  %v286_v16 = vsub.f32 %v1777_v55, %v2177_v11 }
  0x39   :  { %179 = vmatpush.xpose.msra.mxu0 %v1713_v47  ;;  %264 = vmatpush.xpose.msra.mxu1 %v263_v21  ;;  %v537_v21 = vsub.f32 %v1746_v7, %v2170_v41  ;;  %v2176_v41 = vand.u32 4294901760, %v1785_v58  ;;  %v287_v56 = vand.u32 4294901760, %v286_v16 }
  0x3a   :  { %375 = vmatpush.xpose.msra.mxu3 %v1713_v47 }
  0x3b   :  { %335 = vmatpush.xpose.msra.mxu2 %v1738_v1  ;;  %v549_v63 = vsub.f32 %v1785_v58, %v2176_v41  ;;  %v1841_v41 = vand.u32 4294901760, %v132_v13 }
  0x3d   :  { %181 = vmatpush.xpose.msra.mxu0 %v1734_v62  ;;  %270 = vmatpush.xpose.msra.mxu1 %v269_v44  ;;  %v538_v44 = vand.u32 4294901760, %v537_v21  ;;  %v554_v21 = vand.u32 4294901760, %v1809_v50 }
  0x3e   :  { %377 = vmatpush.xpose.msra.mxu3 %v1734_v62 }
  0x3f   :  { %338 = vmatpush.xpose.msra.mxu2 %v1757_v31  ;;  %v555_v4 = vsub.f32 %v1809_v50, %v554_v21 }
  0x41   :  { %183 = vmatpush.xpose.msra.mxu0 %v1753_v26  ;;  %276 = vmatpush.xpose.msra.mxu1 %v275_v34  ;;  %v1832_v34 = vand.u32 4294901760, %v135_v37 }
  0x42   :  { %379 = vmatpush.xpose.msra.mxu3 %v1753_v26 }
  0x43   :  { %341 = vmatpush.xpose.msra.mxu2 %v1777_v55  ;;  %v1848_v11 = vsub.f32 %v135_v37, %v1832_v34  ;;  %v556_v37 = vand.u32 4294901760, %v555_v4 }
  0x45   :  { %390 = vmatpush.xpose.msrb.mxu0 %v195_v18  ;;  %v35_v18 = vld [vmem:[%s2165_s1 + $0xc0] sm:$0xff]  ;;  %282 = vmatpush.xpose.msra.mxu1 %v281_v57  ;;  %v561_v57 = vsub.f32 %v1830_v27, %v560_v30 }
  0x46   :  { %539 = vmatpush.xpose.msrb.mxu3 %v538_v44  ;;  %v550_v44 = vand.u32 4294901760, %v549_v63  ;;  %v129_v2 = vsel %vm52_vm0, %v35_v18, 0 }
  0x47   :  { %494 = vmatpush.xpose.msrb.mxu2 %v1724_v54  ;;  %v1861_v16 = vand.u32 4294901760, %v129_v2 }
  0x49   :  { %394 = vmatpush.xpose.msrb.mxu0 %v201_v19  ;;  %288 = vmatpush.xpose.msra.mxu1 %v287_v56  ;;  %v1859_v19 = vsub.f32 %v132_v13, %v1841_v41  ;;  %v1877_v63 = vsub.f32 %v129_v2, %v1861_v16  ;;  %v562_v13 = vand.u32 4294901760, %v561_v57  ;;  %v1882_v56 = vand.u32 4294901760, %v126_v15 }
  0x4a   :  { %545 = vmatpush.xpose.msrb.mxu3 %v544_v43  ;;  %v566_v43 = vand.u32 4294901760, %v1848_v11 }
  0x4b   :  { %496 = vmatpush.xpose.msrb.mxu2 %v1742_v5  ;;  %v2179_v2 = vand.u32 4294901760, %v1877_v63  ;;  %v1897_v4 = vsub.f32 %v126_v15, %v1882_v56 }
  0x4c   :  { %v567_v18 = vsub.f32 %v1848_v11, %v566_v43 }
  0x4d   :  { %398 = vmatpush.xpose.msrb.mxu0 %v207_v24  ;;  %457 = vmatpush.xpose.msrb.mxu1 %v1527_v8  ;;  %v33_v8 = vld [vmem:[%s2165_s1 + $0xb0] sm:$0xff]  ;;  %v572_v24 = vand.u32 4294901760, %v1859_v19 }
  0x4e   :  { %551 = vmatpush.xpose.msrb.mxu3 %v550_v44  ;;  %v123_v25 = vsel %vm52_vm0, %v33_v8, 0  ;;  %v568_v44 = vand.u32 4294901760, %v567_v18  ;;  %v579_v8 = vsub.f32 %v1877_v63, %v2179_v2  ;;  %v2180_v18 = vand.u32 4294901760, %v1897_v4 }
  0x4f   :  { %498 = vmatpush.xpose.msrb.mxu2 %v1766_v40  ;;  %v1899_v14 = vand.u32 4294901760, %v123_v25 }
  0x51   :  { %402 = vmatpush.xpose.msrb.mxu0 %v213_v32  ;;  %459 = vmatpush.xpose.msrb.mxu1 %v1529_v9  ;;  %v32_v9 = vld [vmem:[%s2165_s1 + $0xa8] sm:$0xff]  ;;  %v573_v32 = vsub.f32 %v1859_v19, %v572_v24 }
  0x52   :  { %557 = vmatpush.xpose.msrb.mxu3 %v556_v37  ;;  %v120_v37 = vsel %vm52_vm0, %v32_v9, 0  ;;  %v1922_v9 = vsub.f32 %v123_v25, %v1899_v14 }
  0x53   :  { %500 = vmatpush.xpose.msrb.mxu2 %v1791_v22  ;;  %v574_v15 = vand.u32 4294901760, %v573_v32 }
  0x55   :  { %406 = vmatpush.xpose.msrb.mxu0 %v219_v38  ;;  %461 = vmatpush.xpose.msrb.mxu1 %v1531_v10  ;;  %v31_v10 = vld [vmem:[%s2165_s1 + $0xa0] sm:$0xff]  ;;  %v54_v38 = vsel %vm52_vm0, %v43_v33, 0 }
  0x56   :  { %563 = vmatpush.xpose.msrb.mxu3 %v562_v13  ;;  %v1910_v57 = vand.u32 4294901760, %v54_v38  ;;  %v1918_v13 = vand.u32 4294901760, %v120_v37  ;;  %v117_v33 = vsel %vm52_vm0, %v31_v10, 0  ;;  %v585_v10 = vsub.f32 %v1897_v4, %v2180_v18 }
  0x57   :  { %502 = vmatpush.xpose.msrb.mxu2 %v1811_v51  ;;  %v1943_v32 = vand.u32 4294901760, %v117_v33 }
  0x58   :  { %v1926_v39 = vsub.f32 %v54_v38, %v1910_v57  ;;  %290 = vmatmul.f32.vlgmr.msra.gmra.mxu1 %v1910_v57  ;;  %v1941_v25 = vsub.f32 %v120_v37, %v1918_v13  ;;  %v590_v38 = vand.u32 4294901760, %v1922_v9 }
  0x59   :  { %410 = vmatpush.xpose.msrb.mxu0 %v225_v46  ;;  %463 = vmatpush.xpose.msrb.mxu1 %v1534_v12  ;;  %v30_v12 = vld [vmem:[%s2165_s1 + $0x98] sm:$0xff] }
  0x5a   :  { %569 = vmatpush.xpose.msrb.mxu3 %v568_v44  ;;  %344 = vmatmul.f32.vlgmr.msra.gmra.mxu2 %v1926_v39  ;;  %v1935_v46 = vand.u32 4294901760, %v1926_v39  ;;  %v580_v44 = vand.u32 4294901760, %v579_v8  ;;  %v2181_v37 = vand.u32 4294901760, %v1941_v25  ;;  %v586_v8 = vand.u32 4294901760, %v585_v10 }
  0x5b   :  { %504 = vmatpush.xpose.msrb.mxu2 %v1832_v34 }
  0x5c   :  { %v187_v2 = vsub.f32 %v1926_v39, %v1935_v46  ;;  %383 = vmatmul.f32.vlgmr.msra.gmra.mxu3 %v1935_v46 }
  0x5d   :  { %414 = vmatpush.xpose.msrb.mxu0 %v231_v49  ;;  %465 = vmatpush.xpose.msrb.mxu1 %v1554_v20  ;;  %v114_v20 = vsel %vm52_vm0, %v30_v12, 0  ;;  %v591_v12 = vsub.f32 %v1922_v9, %v590_v38 }
  0x5e   :  { %575 = vmatpush.xpose.msrb.mxu3 %v574_v15  ;;  %v1957_v49 = vand.u32 4294901760, %v187_v2  ;;  %v1964_v15 = vsub.f32 %v117_v33, %v1943_v32  ;;  %v1969_v18 = vand.u32 4294901760, %v114_v20  ;;  %v597_v2 = vsub.f32 %v1941_v25, %v2181_v37 }
  0x5f   :  { %506 = vmatpush.xpose.msrb.mxu2 %v1841_v41  ;;  %v2002_v37 = vsub.f32 %v111_v53, %v1987_v42 }
  0x60   :  { %189 = vmatmul.f32.vlgmr.msra.gmra.mxu0 %v1957_v49  ;;  %v2182_v33 = vand.u32 4294901760, %v1964_v15  ;;  %v1985_v10 = vsub.f32 %v114_v20, %v1969_v18 }
  0x61   :  { %418 = vmatpush.xpose.msrb.mxu0 %v237_v60  ;;  %467 = vmatpush.xpose.msrb.mxu1 %v1573_v28  ;;  %v28_v28 = vld [vmem:[%s2165_s1 + $0x88] sm:$0xff]  ;;  %v2183_v60 = vand.u32 4294901760, %v1646_v61 }
  0x62   :  { %581 = vmatpush.xpose.msrb.mxu3 %v580_v44  ;;  %v592_v44 = vand.u32 4294901760, %v591_v12  ;;  %v108_v61 = vsel %vm52_vm0, %v28_v28, 0  ;;  %v603_v20 = vsub.f32 %v1964_v15, %v2182_v33  ;;  %v608_v12 = vand.u32 4294901760, %v1985_v10 }
  0x63   :  { %508 = vmatpush.xpose.msrb.mxu2 %v1861_v16  ;;  %v2004_v28 = vand.u32 4294901760, %v108_v61  ;;  %v614_v33 = vand.u32 4294901760, %v2002_v37 }
  0x64   :  { %v609_v53 = vsub.f32 %v1985_v10, %v608_v12 }
  0x65   :  { %422 = vmatpush.xpose.msrb.mxu0 %v2183_v60  ;;  %469 = vmatpush.xpose.msrb.mxu1 %v1589_v35  ;;  %v27_v35 = vld [vmem:[%s2165_s1 + $0x80] sm:$0xff]  ;;  %v2184_v60 = vand.u32 4294901760, %v1661_v3 }
  0x66   :  { %587 = vmatpush.xpose.msrb.mxu3 %v586_v8  ;;  %v598_v8 = vand.u32 4294901760, %v597_v2  ;;  %v105_v3 = vsel %vm52_vm0, %v27_v35, 0  ;;  %v2185_v2 = vand.u32 4294901760, %v1677_v17  ;;  %v2019_v35 = vsub.f32 %v108_v61, %v2004_v28 }
  0x67   :  { %510 = vmatpush.xpose.msrb.mxu2 %v1882_v56  ;;  %v2186_v17 = vand.u32 4294901760, %v1686_v23 }
  0x69   :  { %426 = vmatpush.xpose.msrb.mxu0 %v2184_v60  ;;  %471 = vmatpush.xpose.msrb.mxu1 %v1612_v45  ;;  %v1493_v60 = vmov 0   ;;  %v46_v45 = vld [vmem:[%s2166_s0 + $0x18] sm:$0xff] }
  0x6a   :  { %593 = vmatpush.xpose.msrb.mxu3 %v592_v44  ;;  %1484 = vset.pattern.permute.xlu0 %v1493_v60  ;;  %v604_v44 = vand.u32 4294901760, %v603_v20  ;;  %v2021_v60 = vand.u32 4294901760, %v105_v3  ;;  %v620_v20 = vand.u32 4294901760, %v2019_v35 }
  0x6b   :  { %512 = vmatpush.xpose.msrb.mxu2 %v1899_v14  ;;  %49 = vperm.xlu0 %1484, %v46_v45   ;;  %v2187_v45 = vand.u32 4294901760, %v1716_v48 }
  0x6c   :  { %v2032_v61 = vsub.f32 %v105_v3, %v2021_v60  ;;  %v621_v23 = vsub.f32 %v2019_v35, %v620_v20  ;;  %v2188_v3 = vand.u32 4294901760, %v1738_v1  ;;  %v2190_v1 = vand.u32 4294901760, %v1777_v55 }
  0x6d   :  { %430 = vmatpush.xpose.msrb.mxu0 %v2185_v2  ;;  %473 = vmatpush.xpose.msrb.mxu1 %v1626_v52  ;;  %v610_v52 = vand.u32 4294901760, %v609_v53 }
  0x6e   :  { %599 = vmatpush.xpose.msrb.mxu3 %v598_v8  ;;  %v615_v8 = vsub.f32 %v2002_v37, %v614_v33  ;;  %v626_v2 = vand.u32 4294901760, %v2032_v61  ;;  %v622_v48 = vand.u32 4294901760, %v621_v23 }
  0x6f   :  { %514 = vmatpush.xpose.msrb.mxu2 %v1918_v13 }
  0x71   :  { %434 = vmatpush.xpose.msrb.mxu0 %v2186_v17  ;;  %475 = vmatpush.xpose.msrb.mxu1 %v1642_v59  ;;  %v616_v59 = vand.u32 4294901760, %v615_v8 }
  0x72   :  { %605 = vmatpush.xpose.msrb.mxu3 %v604_v44  ;;  %v2189_v44 = vand.u32 4294901760, %v1757_v31 }
  0x73   :  { %516 = vmatpush.xpose.msrb.mxu2 %v1943_v32 }
  0x75   :  { %438 = vmatpush.xpose.msrb.mxu0 %v2187_v45  ;;  %477 = vmatpush.xpose.msrb.mxu1 %v1653_v0  ;;  %v627_v0 = vsub.f32 %v2032_v61, %v626_v2 }
  0x76   :  { %611 = vmatpush.xpose.msrb.mxu3 %v610_v52 }
  0x77   :  { %518 = vmatpush.xpose.msrb.mxu2 %v1969_v18  ;;  %v628_v53 = vand.u32 4294901760, %v627_v0 }
  0x79   :  { %442 = vmatpush.xpose.msrb.mxu0 %v2188_v3  ;;  %479 = vmatpush.xpose.msrb.mxu1 %v1669_v6  ;;  %v2191_v6 = vand.u32 4294901760, %v1746_v7 }
  0x7a   :  { %617 = vmatpush.xpose.msrb.mxu3 %v616_v59 }
  0x7b   :  { %520 = vmatpush.xpose.msrb.mxu2 %v1987_v42 }
  0x7d   :  { %446 = vmatpush.xpose.msrb.mxu0 %v2189_v44  ;;  %481 = vmatpush.xpose.msrb.mxu1 %v1692_v29  ;;  %v2192_v29 = vand.u32 4294901760, %v1764_v36 }
  0x7e   :  { %623 = vmatpush.xpose.msrb.mxu3 %v622_v48 }
  0x7f   :  { %522 = vmatpush.xpose.msrb.mxu2 %v2004_v28 }
  0x81   :  { %450 = vmatpush.xpose.msrb.mxu0 %v2190_v1  ;;  %483 = vmatpush.xpose.msrb.mxu1 %v1713_v47  ;;  %v2193_v47 = vand.u32 4294901760, %v1785_v58 }
  0x82   :  { %629 = vmatpush.xpose.msrb.mxu3 %v628_v53 }
  0x83   :  { %524 = vmatpush.xpose.msrb.mxu2 %v2021_v60 }
  0x84   :  { %452 = vmatmul.f32.vlgmr.msrb.gmra.mxu0 %v1910_v57 }
  0x85   :  { %637 = vmatpush.xpose.msra.mxu0 %v1746_v7  ;;  %485 = vmatpush.xpose.msrb.mxu1 %v1734_v62  ;;  %v2195_v62 = vand.u32 4294901760, %v1897_v4  ;;  %v2197_v7 = vand.u32 4294901760, %v1964_v15 }
  0x86   :  { %798 = vmatpush.xpose.msra.mxu3 %v1724_v54  ;;  %530 = vmatmul.f32.vlgmr.msrb.gmra.mxu2 %v1957_v49 }
  0x87   :  { %731 = vmatpush.xpose.msra.mxu2 %v2191_v6  ;;  %631 = vmatmul.f32.vlgmr.msrb.gmra.mxu3 %v1910_v57  ;;  %v45_v6 = vld [vmem:[%s2166_s0 + $0x10] sm:$0xff] }
  0x89   :  { %640 = vmatpush.xpose.msra.mxu0 %v1764_v36  ;;  %487 = vmatpush.xpose.msrb.mxu1 %v1753_v26 }
  0x8a   :  { %800 = vmatpush.xpose.msra.mxu3 %v1742_v5 }
  0x8b   :  { %735 = vmatpush.xpose.msra.mxu2 %v2192_v29  ;;  %v1134_v29 = vsel %vm52_vm0, %v45_v6, 0 }
  0x8c   :  { %489 = vmatmul.f32.vlgmr.msrb.gmra.mxu1 %v1910_v57 }
  0x8d   :  { %643 = vmatpush.xpose.msra.mxu0 %v1785_v58  ;;  %690 = vmatpush.xpose.msra.mxu1 %v1724_v54  ;;  %v2194_v54 = vand.u32 4294901760, %v1877_v63 }
  0x8e   :  { %802 = vmatpush.xpose.msra.mxu3 %v1766_v40 }
  0x8f   :  { %739 = vmatpush.xpose.msra.mxu2 %v2193_v47 }
  0x91   :  { %646 = vmatpush.xpose.msra.mxu0 %v1809_v50  ;;  %692 = vmatpush.xpose.msra.mxu1 %v1742_v5  ;;  %v2196_v5 = vand.u32 4294901760, %v1941_v25 }
  0x92   :  { %804 = vmatpush.xpose.msra.mxu3 %v1791_v22 }
  0x93   :  { %743 = vmatpush.xpose.msra.mxu2 %v554_v21 }
  0x95   :  { %649 = vmatpush.xpose.msra.mxu0 %v1830_v27  ;;  %694 = vmatpush.xpose.msra.mxu1 %v1766_v40 }
  0x96   :  { %806 = vmatpush.xpose.msra.mxu3 %v1811_v51 }
  0x97   :  { %747 = vmatpush.xpose.msra.mxu2 %v560_v30 }
  0x99   :  { %652 = vmatpush.xpose.msra.mxu0 %v1848_v11  ;;  %696 = vmatpush.xpose.msra.mxu1 %v1791_v22 }
  0x9a   :  { %808 = vmatpush.xpose.msra.mxu3 %v1832_v34 }
  0x9b   :  { %751 = vmatpush.xpose.msra.mxu2 %v566_v43 }
  0x9d   :  { %655 = vmatpush.xpose.msra.mxu0 %v1859_v19  ;;  %698 = vmatpush.xpose.msra.mxu1 %v1811_v51 }
  0x9e   :  { %810 = vmatpush.xpose.msra.mxu3 %v1841_v41 }
  0x9f   :  { %755 = vmatpush.xpose.msra.mxu2 %v572_v24 }
  0xa1   :  { %658 = vmatpush.xpose.msra.mxu0 %v1877_v63  ;;  %700 = vmatpush.xpose.msra.mxu1 %v1832_v34  ;;  %v44_v63 = vld [vmem:[%s2166_s0 + $0x8] sm:$0xff] }
  0xa2   :  { %812 = vmatpush.xpose.msra.mxu3 %v1861_v16 }
  0xa3   :  { %759 = vmatpush.xpose.msra.mxu2 %v2194_v54  ;;  %v1153_v54 = vand.u32 4294901760, %v1134_v29 }
  0xa5   :  { %661 = vmatpush.xpose.msra.mxu0 %v1897_v4  ;;  %702 = vmatpush.xpose.msra.mxu1 %v1841_v41 }
  0xa6   :  { %814 = vmatpush.xpose.msra.mxu3 %v1882_v56 }
  0xa7   :  { %763 = vmatpush.xpose.msra.mxu2 %v2195_v62 }
  0xa9   :  { %664 = vmatpush.xpose.msra.mxu0 %v1922_v9  ;;  %704 = vmatpush.xpose.msra.mxu1 %v1861_v16 }
  0xaa   :  { %816 = vmatpush.xpose.msra.mxu3 %v1899_v14 }
  0xab   :  { %767 = vmatpush.xpose.msra.mxu2 %v590_v38 }
  0xad   :  { %667 = vmatpush.xpose.msra.mxu0 %v1941_v25  ;;  %706 = vmatpush.xpose.msra.mxu1 %v1882_v56  ;;  %v837_v56 = vsel %vm52_vm0, %v44_v63, 0 }
  0xae   :  { %818 = vmatpush.xpose.msra.mxu3 %v1918_v13  ;;  %v856_v4 = vand.u32 4294901760, %v837_v56 }
  0xaf   :  { %771 = vmatpush.xpose.msra.mxu2 %v2196_v5  ;;  %v1154_v5 = vsub.f32 %v1134_v29, %v1153_v54 }
  0xb1   :  { %670 = vmatpush.xpose.msra.mxu0 %v1964_v15  ;;  %708 = vmatpush.xpose.msra.mxu1 %v1899_v14  ;;  %v857_v14 = vsub.f32 %v837_v56, %v856_v4 }
  0xb2   :  { %820 = vmatpush.xpose.msra.mxu3 %v1943_v32 }
  0xb3   :  { %775 = vmatpush.xpose.msra.mxu2 %v2197_v7 }
  0xb5   :  { %673 = vmatpush.xpose.msra.mxu0 %v1985_v10  ;;  %710 = vmatpush.xpose.msra.mxu1 %v1918_v13 }
  0xb6   :  { %822 = vmatpush.xpose.msra.mxu3 %v1969_v18 }
  0xb7   :  { %779 = vmatpush.xpose.msra.mxu2 %v608_v12 }
  0xb9   :  { %676 = vmatpush.xpose.msra.mxu0 %v2002_v37  ;;  %712 = vmatpush.xpose.msra.mxu1 %v1943_v32 }
  0xba   :  { %824 = vmatpush.xpose.msra.mxu3 %v1987_v42 }
  0xbb   :  { %783 = vmatpush.xpose.msra.mxu2 %v614_v33 }
  0xbd   :  { %679 = vmatpush.xpose.msra.mxu0 %v2019_v35  ;;  %714 = vmatpush.xpose.msra.mxu1 %v1969_v18 }
  0xbe   :  { %826 = vmatpush.xpose.msra.mxu3 %v2004_v28 }
  0xbf   :  { %787 = vmatpush.xpose.msra.mxu2 %v620_v20 }
  0xc1   :  { %682 = vmatpush.xpose.msra.mxu0 %v2032_v61  ;;  %716 = vmatpush.xpose.msra.mxu1 %v1987_v42 }
  0xc2   :  { %828 = vmatpush.xpose.msra.mxu3 %v2021_v60 }
  0xc3   :  { %791 = vmatpush.xpose.msra.mxu2 %v626_v2 }
  0xc4   :  { %685 = vmatmul.f32.vlgmr.msra.gmra.mxu0 %v1926_v39 }
  0xc5   :  { %718 = vmatpush.xpose.msra.mxu1 %v2004_v28  ;;  %830 = vmatmul.f32.vlgmr.msra.gmra.mxu3 %v1910_v57 }
  0xc6   :  { %793 = vmatmul.f32.vlgmr.msra.gmra.mxu2 %v1910_v57  ;;  %v858_v57 = vand.u32 4294901760, %v857_v14 }
  0xc8   :  { %v859_v13 = vsub.f32 %v857_v14, %v858_v57 }
  0xc9   :  { %720 = vmatpush.xpose.msra.mxu1 %v2021_v60 }
  0xca   :  { %v860_v18 = vand.u32 4294901760, %v859_v13 }
  0xcc   :  { %724 = vmatmul.f32.vlgmr.msra.gmra.mxu1 %v1935_v46 }
  0xd5   :  { %v291_v40 = vpop.f32.mrf.mxu1 }
  0xdd   :  { %v50_v26 = vpop.permute.xlu0 %49  ;;  %v190_v31 = vpop.f32.mrf.mxu0 }
  0xde   :  { %v191_v36 = vadd.f32 %v190_v31, %v50_v26  ;;  %v345_v51 = vpop.f32.mrf.mxu2 }
  0xdf   :  { %v384_v58 = vpop.f32.mrf.mxu3 }
  0xe0   :  { %v292_v41 = vadd.f32 %v291_v40, %v191_v36 }
  0xe2   :  { %v346_v55 = vadd.f32 %v345_v51, %v292_v41 }
  0xe4   :  { %v385_v22 = vadd.f32 %v384_v58, %v346_v55 }
 0x101   :  { %v453_v11 = vpop.f32.mrf.mxu0 }
 0x102   :  { %v454_v50 = vadd.f32 %v453_v11, %v385_v22 }
 0x109   :  { %v490_v21 = vpop.f32.mrf.mxu1  ;;  %v531_v9 = vpop.f32.mrf.mxu2 }
 0x10a   :  { %v491_v27 = vadd.f32 %v490_v21, %v454_v50  ;;  %v532_v39 = vadd.f32 %v531_v9, %v50_v26  ;;  %v632_v46 = vpop.f32.mrf.mxu3  ;;  %v1155_v26 = vand.u32 4294901760, %v1154_v5 }
 0x10c   :  { %v834_v34 = vmax.f32 %v491_v27, 0.0  ;;  %v633_v25 = vadd.f32 %v632_v46, %v532_v39  ;;  %v1156_v31 = vsub.f32 %v1154_v5, %v1155_v26 }
 0x10e   :  { %v854_v30 = vand.u32 4294901760, %v834_v34  ;;  %v1157_v40 = vand.u32 4294901760, %v1156_v31 }
 0x110   :  { %v881_v19 = vsub.f32 %v834_v34, %v854_v30  ;;  %855 = vmatpush.msrb.mxu0 %v854_v30  ;;  %931 = vmatpush.msrb.mxu3 %v854_v30 }
 0x111   :  { %935 = vmatmul.f32.vlgmr.msrb.gmra.mxu3 %v858_v57  ;;  %861 = vmatmul.f32.vlgmr.msrb.gmra.mxu0 %v860_v18 }
 0x112   :  { %v882_v16 = vand.u32 4294901760, %v881_v19  ;;  %908 = vmatpush.msrb.mxu2 %v881_v19 }
 0x113   :  { %911 = vmatmul.f32.vlgmr.msrb.gmra.mxu2 %v857_v14 }
 0x114   :  { %v883_v43 = vsub.f32 %v881_v19, %v882_v16  ;;  %957 = vmatpush.msra.mxu0 %v882_v16 }
 0x116   :  { %v884_v24 = vand.u32 4294901760, %v883_v43 }
 0x118   :  { %885 = vmatpush.msrb.mxu1 %v884_v24 }
 0x119   :  { %887 = vmatmul.f32.vlgmr.msrb.gmra.mxu1 %v856_v4  ;;  %959 = vmatmul.f32.vlgmr.msra.gmra.mxu0 %v856_v4 }
 0x11a   :  { %979 = vmatpush.msra.mxu1 %v854_v30 }
 0x121   :  { %981 = vmatmul.f32.vlgmr.msra.gmra.mxu1 %v856_v4 }
 0x141   :  { %v686_v32 = vpop.f32.mrf.mxu0 }
 0x142   :  { %v687_v38 = vadd.f32 %v686_v32, %v633_v25 }
 0x148   :  { %v831_v33 = vpop.f32.mrf.mxu3 }
 0x149   :  { %v725_v49 = vpop.f32.mrf.mxu1  ;;  %v794_v37 = vpop.f32.mrf.mxu2 }
 0x14a   :  { %v726_v15 = vadd.f32 %v725_v49, %v687_v38 }
 0x14c   :  { %v795_v10 = vadd.f32 %v794_v37, %v726_v15 }
 0x14e   :  { %v832_v42 = vadd.f32 %v831_v33, %v795_v10 }
 0x150   :  { %v835_v12 = vmax.f32 %v832_v42, 0.0 }
 0x152   :  { %v1000_v28 = vand.u32 4294901760, %v835_v12 }
 0x154   :  { %v1027_v35 = vsub.f32 %v835_v12, %v1000_v28  ;;  %1001 = vmatpush.msra.mxu2 %v1000_v28  ;;  %1077 = vmatpush.msrb.mxu1 %v1000_v28 }
 0x155   :  { %1007 = vmatmul.f32.vlgmr.msra.gmra.mxu2 %v860_v18  ;;  %1081 = vmatmul.f32.vlgmr.msrb.gmra.mxu1 %v858_v57 }
 0x156   :  { %v1028_v60 = vand.u32 4294901760, %v1027_v35  ;;  %1054 = vmatpush.msrb.mxu0 %v1027_v35 }
 0x157   :  { %1057 = vmatmul.f32.vlgmr.msrb.gmra.mxu0 %v857_v14 }
 0x158   :  { %v1029_v17 = vsub.f32 %v1027_v35, %v1028_v60  ;;  %1103 = vmatpush.msrb.mxu2 %v1028_v60 }
 0x15a   :  { %v1030_v52 = vand.u32 4294901760, %v1029_v17 }
 0x15c   :  { %1031 = vmatpush.msra.mxu3 %v1030_v52 }
 0x15d   :  { %1033 = vmatmul.f32.vlgmr.msra.gmra.mxu3 %v856_v4  ;;  %1105 = vmatmul.f32.vlgmr.msrb.gmra.mxu2 %v856_v4 }
 0x15e   :  { %1125 = vmatpush.msrb.mxu3 %v1000_v28 }
 0x165   :  { %1127 = vmatmul.f32.vlgmr.msrb.gmra.mxu3 %v856_v4 }
 0x18e   :  { %v862_v20 = vpop.f32.mrf.mxu0 }
 0x194   :  { %v936_v59 = vpop.f32.mrf.mxu3 }
 0x196   :  { %v888_v8 = vpop.f32.mrf.mxu1  ;;  %v912_v61 = vpop.f32.mrf.mxu2 }
 0x197   :  { %v889_v45 = vadd.f32 %v888_v8, %v862_v20  ;;  %v960_v3 = vpop.f32.mrf.mxu0 }
 0x199   :  { %v913_v23 = vadd.f32 %v912_v61, %v889_v45 }
 0x19b   :  { %v937_v2 = vadd.f32 %v936_v59, %v913_v23 }
 0x19d   :  { %v961_v0 = vadd.f32 %v960_v3, %v937_v2 }
 0x19e   :  { %v982_v48 = vpop.f32.mrf.mxu1 }
 0x19f   :  { %v983_v44 = vadd.f32 %v982_v48, %v961_v0 }
 0x1a1   :  { %v1131_v53 = vmax.f32 %v983_v44, 0.0 }
 0x1a3   :  { %v1151_v1 = vand.u32 4294901760, %v1131_v53 }
 0x1a5   :  { %v1178_v47 = vsub.f32 %v1131_v53, %v1151_v1  ;;  %1152 = vmatpush.msra.mxu0 %v1151_v1  ;;  %1228 = vmatpush.msra.mxu3 %v1151_v1 }
 0x1a6   :  { %1232 = vmatmul.f32.vlgmr.msra.gmra.mxu3 %v1155_v26  ;;  %1158 = vmatmul.f32.vlgmr.msra.gmra.mxu0 %v1157_v40 }
 0x1a7   :  { %v1179_v62 = vand.u32 4294901760, %v1178_v47  ;;  %1205 = vmatpush.msra.mxu2 %v1178_v47 }
 0x1a8   :  { %1208 = vmatmul.f32.vlgmr.msra.gmra.mxu2 %v1154_v5 }
 0x1a9   :  { %v1180_v7 = vsub.f32 %v1178_v47, %v1179_v62  ;;  %1254 = vmatpush.msrb.mxu0 %v1179_v62 }
 0x1ab   :  { %v1181_v36 = vand.u32 4294901760, %v1180_v7 }
 0x1ad   :  { %1182 = vmatpush.msra.mxu1 %v1181_v36 }
 0x1ae   :  { %1184 = vmatmul.f32.vlgmr.msra.gmra.mxu1 %v1153_v54  ;;  %1256 = vmatmul.f32.vlgmr.msrb.gmra.mxu0 %v1153_v54 }
 0x1af   :  { %1276 = vmatpush.msrb.mxu1 %v1151_v1 }
 0x1b6   :  { %1278 = vmatmul.f32.vlgmr.msrb.gmra.mxu1 %v1153_v54 }
 0x1d2   :  { %v1082_v22 = vpop.f32.mrf.mxu1 }
 0x1d4   :  { %v1058_v55 = vpop.f32.mrf.mxu0 }
 0x1d8   :  { %v1008_v41 = vpop.f32.mrf.mxu2 }
 0x1e0   :  { %v1034_v51 = vpop.f32.mrf.mxu3  ;;  %v1106_v50 = vpop.f32.mrf.mxu2 }
 0x1e1   :  { %v1035_v58 = vadd.f32 %v1034_v51, %v1008_v41 }
 0x1e3   :  { %v1059_v11 = vadd.f32 %v1058_v55, %v1035_v58 }
 0x1e5   :  { %v1083_v21 = vadd.f32 %v1082_v22, %v1059_v11 }
 0x1e7   :  { %v1107_v27 = vadd.f32 %v1106_v50, %v1083_v21 }
 0x1e8   :  { %v1128_v34 = vpop.f32.mrf.mxu3 }
 0x1e9   :  { %v1129_v30 = vadd.f32 %v1128_v34, %v1107_v27 }
 0x1eb   :  { %v1132_v19 = vmax.f32 %v1129_v30, 0.0 }
 0x1ed   :  { %v1297_v16 = vand.u32 4294901760, %v1132_v19 }
 0x1ef   :  { %v1324_v43 = vsub.f32 %v1132_v19, %v1297_v16  ;;  %1298 = vmatpush.msrb.mxu2 %v1297_v16  ;;  %1374 = vmatpush.msra.mxu1 %v1297_v16 }
 0x1f0   :  { %1304 = vmatmul.f32.vlgmr.msrb.gmra.mxu2 %v1157_v40  ;;  %1378 = vmatmul.f32.vlgmr.msra.gmra.mxu1 %v1155_v26  ;;  %v1472_v26 = vlaneseq }
 0x1f1   :  { %v1325_v24 = vand.u32 4294901760, %v1324_v43  ;;  %1351 = vmatpush.msra.mxu0 %v1324_v43 }
 0x1f2   :  { %1354 = vmatmul.f32.vlgmr.msra.gmra.mxu0 %v1154_v5  ;;  %vm1474_vm10 = vcmp.lt.s32.totalorder %v1472_v26, 256 }
 0x1f3   :  { %v1326_v63 = vsub.f32 %v1324_v43, %v1325_v24  ;;  %1400 = vmatpush.msra.mxu2 %v1325_v24 }
 0x1f5   :  { %v1327_v56 = vand.u32 4294901760, %v1326_v63 }
 0x1f7   :  { %1328 = vmatpush.msrb.mxu3 %v1327_v56 }
 0x1f8   :  { %1330 = vmatmul.f32.vlgmr.msrb.gmra.mxu3 %v1153_v54  ;;  %1402 = vmatmul.f32.vlgmr.msra.gmra.mxu2 %v1153_v54 }
 0x1f9   :  { %1422 = vmatpush.msra.mxu3 %v1297_v16 }
 0x200   :  { %1424 = vmatmul.f32.vlgmr.msra.gmra.mxu3 %v1153_v54 }
 0x223   :  { %v1159_v14 = vpop.f32.mrf.mxu0 }
 0x229   :  { %v1233_v9 = vpop.f32.mrf.mxu3 }
 0x22b   :  { %v1185_v4 = vpop.f32.mrf.mxu1  ;;  %v1209_v13 = vpop.f32.mrf.mxu2 }
 0x22c   :  { %v1186_v57 = vadd.f32 %v1185_v4, %v1159_v14  ;;  %v1257_v46 = vpop.f32.mrf.mxu0 }
 0x22e   :  { %v1210_v18 = vadd.f32 %v1209_v13, %v1186_v57 }
 0x230   :  { %v1234_v39 = vadd.f32 %v1233_v9, %v1210_v18 }
 0x232   :  { %v1258_v25 = vadd.f32 %v1257_v46, %v1234_v39 }
 0x233   :  { %v1279_v32 = vpop.f32.mrf.mxu1 }
 0x234   :  { %v1280_v38 = vadd.f32 %v1279_v32, %v1258_v25 }
 0x236   :  { %v1481_v37 = vmul.f32 -1.442695, %v1280_v38 }
 0x238   :  { %1485 = vpow2.f32 %v1481_v37 }
 0x23e   :  { %v1486_v35 = vpop.eup %1485 }
 0x23f   :  { %v1434_v52 = vadd.f32 1.0, %v1486_v35 }
 0x241   :  { %1487 = vrcp.f32 %v1434_v52  ;;  %vm1441_vm1 = vweird.f32 %v1434_v52  ;;  %v1445_v1 = vand.u32 2147483647, %v1434_v52  ;;  %v1447_v6 = vand.u32 2147483648, %v1434_v52 }
 0x243   :  { %v1448_v31 = vor.u32 1.1754944e-38, %v1447_v6  ;;  %vm1446_vm7 = vcmp.eq.f32.partialorder %v1445_v1, 8.507059e+37 }
 0x247   :  { %v1488_v45 = vpop.eup %1487 }
 0x248   :  { %v1437_v2 = vmul.f32 %v1488_v45, %v1434_v52  ;;  %vm1442_vm2 = vweird.f32 %v1488_v45 }
 0x249   :  { %vm2156_vm4 = vmor %vm1441_vm1, %vm1442_vm2 }
 0x24a   :  { %v1438_v3 = vsub.f32 1.0, %v1437_v2 }
 0x24c   :  { %v1439_v0 = vmul.f32 %v1488_v45, %v1438_v3 }
 0x24e   :  { %v1440_v47 = vadd.f32 %v1488_v45, %v1439_v0 }
 0x250   :  { %v1444_v40 = vsel %vm2156_vm4, %v1488_v45, %v1440_v47 }
 0x251   :  { %v1449_v58 = vsel %vm1446_vm7, %v1448_v31, %v1444_v40 }
 0x26d   :  { %v1379_v42 = vpop.f32.mrf.mxu1 }
 0x26f   :  { %v1355_v33 = vpop.f32.mrf.mxu0 }
 0x273   :  { %v1305_v49 = vpop.f32.mrf.mxu2 }
 0x27b   :  { %v1331_v15 = vpop.f32.mrf.mxu3  ;;  %v1403_v28 = vpop.f32.mrf.mxu2 }
 0x27c   :  { %v1332_v10 = vadd.f32 %v1331_v15, %v1305_v49 }
 0x27e   :  { %v1356_v12 = vadd.f32 %v1355_v33, %v1332_v10 }
 0x280   :  { %v1380_v60 = vadd.f32 %v1379_v42, %v1356_v12 }
 0x282   :  { %v1404_v17 = vadd.f32 %v1403_v28, %v1380_v60 }
 0x283   :  { %v1425_v8 = vpop.f32.mrf.mxu3 }
 0x284   :  { %v1426_v20 = vadd.f32 %v1425_v8, %v1404_v17 }
 0x286   :  { %v1482_v61 = vmul.f32 -1.442695, %v1426_v20 }
 0x288   :  { %1489 = vpow2.f32 %v1482_v61 }
 0x28e   :  { %v1490_v59 = vpop.eup %1489 }
 0x28f   :  { %v1435_v23 = vadd.f32 1.0, %v1490_v59 }
 0x291   :  { %1491 = vrcp.f32 %v1435_v23  ;;  %v1462_v29 = vand.u32 2147483648, %v1435_v23  ;;  %v1460_v62 = vand.u32 2147483647, %v1435_v23  ;;  %vm1456_vm5 = vweird.f32 %v1435_v23 }
 0x293   :  { %v1463_v36 = vor.u32 1.1754944e-38, %v1462_v29  ;;  %vm1461_vm8 = vcmp.eq.f32.partialorder %v1460_v62, 8.507059e+37 }
 0x297   :  { %v1492_v48 = vpop.eup %1491 }
 0x298   :  { %v1452_v44 = vmul.f32 %v1492_v48, %v1435_v23  ;;  %vm1457_vm3 = vweird.f32 %v1492_v48 }
 0x299   :  { %vm1458_vm6 = vmor %vm1456_vm5, %vm1457_vm3 }
 0x29a   :  { %v1453_v53 = vsub.f32 1.0, %v1452_v44 }
 0x29c   :  { %v1454_v54 = vmul.f32 %v1492_v48, %v1453_v53 }
 0x29e   :  { %v1455_v7 = vadd.f32 %v1492_v48, %v1454_v54 }
 0x2a0   :  { %v1459_v41 = vsel %vm1458_vm6, %v1492_v48, %v1455_v7 }
 0x2a1   :  { %v1464_v51 = vsel %vm1461_vm8, %v1463_v36, %v1459_v41 }
 0x2a2   :  { %v1468_v55 = vrot.slane %v1464_v51, 7 }
 0x2a4   :  { %v1470_v22 = vsel %vm1469_vm9, %v1449_v58, %v1468_v55 }
 0x2a5   :  { %1476 = vst.msk [vmem:[%s2167_s2] sm:$0x3] %vm1474_vm10, %v1470_v22 }

</bundles_post_ra>
